<compile_context>
chip_gen: v7x
topology: tpu7x:2x2x1
jax: 0.10.0
libtpu: 0.0.40
codegen_flags: <defaults>
</compile_context>

<pallas_src>
import functools

import jax
import jax.numpy as jnp
from jax.experimental import pallas as pl
from jax.experimental.pallas import tpu as pltpu


def _round_up(n, m):
    return ((n + m - 1) // m) * m


def _choose_batch_tiling(B):
    """Pick (batch_tile, padded_batch).

    batch_tile is a multiple of 8 (sublane-aligned); we prefer >=2 tiles so a v7x
    megacore can shard the "parallel" grid axis across both TensorCores, tiles as
    large as 1024 rows to amortize the ~0.35us/grid-step overhead, and tail padding
    bounded to <=12.5% of the real work.
    """
    bp8 = _round_up(B, 8)
    if bp8 <= 8:
        return 8, 8
    for tb in (1024, 512, 256, 128, 64, 32, 16, 8):
        ntiles = -(-bp8 // tb)
        if ntiles < 2:          # keep >=2 tiles for v7x megacore
            continue
        bp = ntiles * tb
        if (bp - bp8) * 8 <= bp8:   # tail padding <= 12.5%
            return tb, bp
    return 8, bp8  # unreachable in practice (tb=8 always qualifies for bp8>=16)


def _decoder_fused_kernel(*refs, num_layers):
    """refs = (x_ref, w0, b0, w1, b1, ..., o_ref). Runs the whole MLP on one batch tile.

    Weights are bf16 (MXU native), accumulation and nonlinearity math are f32.
    """
    x_ref = refs[0]
    o_ref = refs[-1]
    wb = refs[1:-1]

    h = x_ref[...].astype(jnp.float32)
    for i in range(num_layers):
        w_ref, b_ref = wb[2 * i], wb[2 * i + 1]
        y = jnp.dot(h.astype(jnp.bfloat16), w_ref[...],
                    preferred_element_type=jnp.float32) + b_ref[...]
        if i < num_layers - 1:
            # PyTorch nn.Softplus(beta=1, threshold=20): x for x>20 else log1p(exp(x)).
            h = jnp.where(y > 20.0, y, jnp.log1p(jnp.exp(jnp.minimum(y, 20.0))))
        else:
            # Sigmoid: exp on EUP, approx reciprocal on the EUP vrcp slot,
            # one Newton-Raphson step (2 VPU ops) to restore near-f32 precision.
            d = 1.0 + jnp.exp(-y)
            r = pl.reciprocal(d, approx=True)
            h = r * (2.0 - d * r)
    o_ref[...] = h.astype(o_ref.dtype)


def prepare_decoder_params(params):
    """One-time conversion outside the per-call path.

    Weights -> bf16 [in_features, out_features]; biases -> f32 [1, out_features].
    """
    prepared = []
    for w, b in params:
        prepared.append((jnp.asarray(w, jnp.bfloat16),
                         jnp.asarray(b, jnp.float32).reshape(1, -1)))
    return prepared


def decoder_forward(x, prepared_params):
    """Fused forward pass.

    x: [B, z_dim] f32; prepared_params: list of (w bf16 [din,dout], b f32 [1,dout]).
    """
    B, din = x.shape
    num_layers = len(prepared_params)
    dout = prepared_params[-1][0].shape[1]

    # Sanity: layer dims must chain on *logical* (unpadded) dims.
    prev = din
    for (w, _) in prepared_params:
        assert w.shape[0] == prev, f"layer dims must chain: {w.shape[0]} != {prev}"
        prev = w.shape[1]

    tb, bp = _choose_batch_tiling(B)

    xb = x.astype(jnp.float32)
    if bp != B:
        # Only the batch (sublane) dim is padded; feature dims stay unpadded.
        xb = jnp.zeros((bp, din), jnp.float32).at[:B].set(xb)

    flat_inputs = [xb]
    in_specs = [pl.BlockSpec((tb, din), lambda i: (i, 0))]
    for (w, b) in prepared_params:
        flat_inputs += [w, b]
        in_specs += [
            pl.BlockSpec(w.shape, lambda i: (0, 0)),  # weights: grid-invariant, VMEM-resident
            pl.BlockSpec(b.shape, lambda i: (0, 0)),  # bias: grid-invariant
        ]

    out = pl.pallas_call(
        functools.partial(_decoder_fused_kernel, num_layers=num_layers),
        out_shape=jax.ShapeDtypeStruct((bp, dout), jnp.float32),
        grid=(bp // tb,),
        in_specs=in_specs,
        out_specs=pl.BlockSpec((tb, dout), lambda i: (i, 0)),
        compiler_params=pltpu.CompilerParams(
            dimension_semantics=("parallel",),  # batch tiles shard across TCs on v7x
        ),
    )(*flat_inputs)

    # No extra slice pass when the batch was already aligned.
    return out if bp == B else out[:B]


def init_decoder_params(key, layers, output_dim):
    """Deterministic init mimicking nn.Linear default: U(-1/sqrt(fan_in), 1/sqrt(fan_in)).

    Weights stored [in_features, out_features] (transpose of PyTorch Linear.weight),
    biases as [1, out_features]. All f32.
    """
    dims = list(layers) + [output_dim]
    params = []
    for i in range(len(dims) - 1):
        fan_in, fan_out = dims[i], dims[i + 1]
        key, kw, kb = jax.random.split(key, 3)
        bound = 1.0 / jnp.sqrt(jnp.float32(fan_in))
        w = jax.random.uniform(kw, (fan_in, fan_out), jnp.float32, -bound, bound)
        b = jax.random.uniform(kb, (1, fan_out), jnp.float32, -bound, bound)
        params.append((w, b))
    return params


def decoder_forward_ref(x, params):
    """Pure-JAX f32 reference for verification."""
    out = x
    n = len(params)
    for i, (w, b) in enumerate(params):
        y = out @ w + b
        out = jax.nn.sigmoid(y) if i == n - 1 else jax.nn.softplus(y)
    return out


def decoder_forward_ref_bf16(x, params):
    """Precision-matched reference: bf16 matmul operands, f32 accumulation + f32 math."""
    out = x.astype(jnp.float32)
    n = len(params)
    for i, (w, b) in enumerate(params):
        y = jnp.dot(out.astype(jnp.bfloat16), w.astype(jnp.bfloat16),
                    preferred_element_type=jnp.float32) + b.astype(jnp.float32)
        if i < n - 1:
            out = jnp.where(y > 20.0, y, jnp.log1p(jnp.exp(jnp.minimum(y, 20.0))))
        else:
            out = 1.0 / (1.0 + jnp.exp(-y))
    return out


if __name__ == "__main__":
    # Decoder(layers=[8, 32, 32], output_dim=64): z_dim=8, two hidden Linear+Softplus,
    # final Linear(32, 64) + Sigmoid.
    layers = [8, 32, 32]
    output_dim = 64
    batch = 2

    key = jax.random.PRNGKey(0)
    key, kx = jax.random.split(key)
    x = jax.random.normal(kx, (batch, layers[0]), jnp.float32)

    params = init_decoder_params(key, layers, output_dim)
    prepared = prepare_decoder_params(params)

    prob = decoder_forward(x, prepared)
    prob = jax.block_until_ready(prob)
    assert prob.shape == (batch, output_dim)

    # Strict check against a precision-matched (bf16-operand) reference.
    ref_matched = decoder_forward_ref_bf16(x, params)
    assert jnp.allclose(prob, ref_matched, atol=1e-3, rtol=1e-3), \
        "mismatch vs precision-matched JAX reference"

    # Looser sanity check against the pure-f32 reference (bf16 operands ~1e-3 level).
    ref_f32 = decoder_forward_ref(x, params)
    assert jnp.allclose(prob, ref_f32, atol=2e-2, rtol=2e-2), \
        "mismatch vs f32 JAX reference"

    print("KERNEL_OK")
</pallas_src>

<mosaic_0001>
module attributes {stable_mosaic.version = 11 : i64} {
  func.func @_decoder_fused_kernel(%arg0: i32, %arg1: memref<8x8xf32, #tpu.memory_space<vmem>>, %arg2: memref<8x32xbf16, #tpu.memory_space<vmem>>, %arg3: memref<1x32xf32, #tpu.memory_space<vmem>>, %arg4: memref<32x32xbf16, #tpu.memory_space<vmem>>, %arg5: memref<1x32xf32, #tpu.memory_space<vmem>>, %arg6: memref<32x64xbf16, #tpu.memory_space<vmem>>, %arg7: memref<1x64xf32, #tpu.memory_space<vmem>>, %arg8: memref<8x64xf32, #tpu.memory_space<vmem>>) attributes {dimension_semantics = [#tpu.dimension_semantics<parallel>], iteration_bounds = array<i64: 1>, scalar_prefetch = 0 : i64, scratch_operands = 0 : i64, tpu.core_type = #tpu.core_type<tc>, window_params = [{transform_indices = @transform_0, window_bounds = array<i64: 8, 8>}, {pipeline_mode = #tpu.pipeline_mode<synchronous>, transform_indices = @transform_1, window_bounds = array<i64: 8, 32>}, {pipeline_mode = #tpu.pipeline_mode<synchronous>, transform_indices = @transform_2, window_bounds = array<i64: 1, 32>}, {pipeline_mode = #tpu.pipeline_mode<synchronous>, transform_indices = @transform_3, window_bounds = array<i64: 32, 32>}, {pipeline_mode = #tpu.pipeline_mode<synchronous>, transform_indices = @transform_4, window_bounds = array<i64: 1, 32>}, {pipeline_mode = #tpu.pipeline_mode<synchronous>, transform_indices = @transform_5, window_bounds = array<i64: 32, 64>}, {pipeline_mode = #tpu.pipeline_mode<synchronous>, transform_indices = @transform_6, window_bounds = array<i64: 1, 64>}, {transform_indices = @transform_7, window_bounds = array<i64: 8, 64>}]} {
    %c0 = arith.constant 0 : index
    %c0_0 = arith.constant 0 : index
    %0 = vector.load %arg1[%c0, %c0_0] : memref<8x8xf32, #tpu.memory_space<vmem>>, vector<8x8xf32>
    %1 = arith.truncf %0 : vector<8x8xf32> to vector<8x8xbf16>
    %c0_1 = arith.constant 0 : index
    %c0_2 = arith.constant 0 : index
    %2 = vector.load %arg2[%c0_1, %c0_2] : memref<8x32xbf16, #tpu.memory_space<vmem>>, vector<8x32xbf16>
    %cst = arith.constant dense<0.000000e+00> : vector<8x32xf32>
    %3 = tpu.matmul %1, %2, %cst {dimension_numbers = #tpu.dot_dimension_numbers<[1], [0], [0], [1], [0, 0, 1, 1], [], []>} : vector<8x8xbf16>, vector<8x32xbf16>, vector<8x32xf32> -> vector<8x32xf32>
    %c0_3 = arith.constant 0 : index
    %c0_4 = arith.constant 0 : index
    %4 = vector.load %arg3[%c0_3, %c0_4] : memref<1x32xf32, #tpu.memory_space<vmem>>, vector<1x32xf32>
    %5 = vector.broadcast %4 : vector<1x32xf32> to vector<8x32xf32>
    %6 = arith.addf %3, %5 : vector<8x32xf32>
    %cst_5 = arith.constant 2.000000e+01 : f32
    %7 = vector.broadcast %cst_5 : f32 to vector<8x32xf32>
    %8 = arith.cmpf ogt, %6, %7 : vector<8x32xf32>
    %cst_6 = arith.constant 2.000000e+01 : f32
    %9 = vector.broadcast %cst_6 : f32 to vector<8x32xf32>
    %10 = arith.minimumf %6, %9 : vector<8x32xf32>
    %11 = math.exp %10 : vector<8x32xf32>
    %12 = math.log1p %11 : vector<8x32xf32>
    %13 = arith.select %8, %6, %12 : vector<8x32xi1>, vector<8x32xf32>
    %14 = arith.truncf %13 : vector<8x32xf32> to vector<8x32xbf16>
    %c0_7 = arith.constant 0 : index
    %c0_8 = arith.constant 0 : index
    %15 = vector.load %arg4[%c0_7, %c0_8] : memref<32x32xbf16, #tpu.memory_space<vmem>>, vector<32x32xbf16>
    %cst_9 = arith.constant dense<0.000000e+00> : vector<8x32xf32>
    %16 = tpu.matmul %14, %15, %cst_9 {dimension_numbers = #tpu.dot_dimension_numbers<[1], [0], [0], [1], [0, 0, 1, 1], [], []>} : vector<8x32xbf16>, vector<32x32xbf16>, vector<8x32xf32> -> vector<8x32xf32>
    %c0_10 = arith.constant 0 : index
    %c0_11 = arith.constant 0 : index
    %17 = vector.load %arg5[%c0_10, %c0_11] : memref<1x32xf32, #tpu.memory_space<vmem>>, vector<1x32xf32>
    %18 = vector.broadcast %17 : vector<1x32xf32> to vector<8x32xf32>
    %19 = arith.addf %16, %18 : vector<8x32xf32>
    %cst_12 = arith.constant 2.000000e+01 : f32
    %20 = vector.broadcast %cst_12 : f32 to vector<8x32xf32>
    %21 = arith.cmpf ogt, %19, %20 : vector<8x32xf32>
    %cst_13 = arith.constant 2.000000e+01 : f32
    %22 = vector.broadcast %cst_13 : f32 to vector<8x32xf32>
    %23 = arith.minimumf %19, %22 : vector<8x32xf32>
    %24 = math.exp %23 : vector<8x32xf32>
    %25 = math.log1p %24 : vector<8x32xf32>
    %26 = arith.select %21, %19, %25 : vector<8x32xi1>, vector<8x32xf32>
    %27 = arith.truncf %26 : vector<8x32xf32> to vector<8x32xbf16>
    %c0_14 = arith.constant 0 : index
    %c0_15 = arith.constant 0 : index
    %28 = vector.load %arg6[%c0_14, %c0_15] : memref<32x64xbf16, #tpu.memory_space<vmem>>, vector<32x64xbf16>
    %cst_16 = arith.constant dense<0.000000e+00> : vector<8x64xf32>
    %29 = tpu.matmul %27, %28, %cst_16 {dimension_numbers = #tpu.dot_dimension_numbers<[1], [0], [0], [1], [0, 0, 1, 1], [], []>} : vector<8x32xbf16>, vector<32x64xbf16>, vector<8x64xf32> -> vector<8x64xf32>
    %c0_17 = arith.constant 0 : index
    %c0_18 = arith.constant 0 : index
    %30 = vector.load %arg7[%c0_17, %c0_18] : memref<1x64xf32, #tpu.memory_space<vmem>>, vector<1x64xf32>
    %31 = vector.broadcast %30 : vector<1x64xf32> to vector<8x64xf32>
    %32 = arith.addf %29, %31 : vector<8x64xf32>
    %cst_19 = arith.constant 0.000000e+00 : f32
    %33 = vector.broadcast %cst_19 : f32 to vector<8x64xf32>
    %34 = arith.subf %33, %32 : vector<8x64xf32>
    %35 = math.exp %34 : vector<8x64xf32>
    %cst_20 = arith.constant 1.000000e+00 : f32
    %36 = vector.broadcast %cst_20 : f32 to vector<8x64xf32>
    %37 = arith.addf %36, %35 : vector<8x64xf32>
    %38 = tpu.reciprocal %37 {approx = true} : vector<8x64xf32> -> vector<8x64xf32>
    %39 = arith.mulf %37, %38 : vector<8x64xf32>
    %cst_21 = arith.constant 2.000000e+00 : f32
    %40 = vector.broadcast %cst_21 : f32 to vector<8x64xf32>
    %41 = arith.subf %40, %39 : vector<8x64xf32>
    %42 = arith.mulf %38, %41 : vector<8x64xf32>
    %c0_22 = arith.constant 0 : index
    %c0_23 = arith.constant 0 : index
    %43 = vector.load %arg8[%c0_22, %c0_23] : memref<8x64xf32, #tpu.memory_space<vmem>>, vector<8x64xf32>
    tpu.vector_store %arg8[%c0_22, %c0_23], %42 {strides = array<i32>} : memref<8x64xf32, #tpu.memory_space<vmem>>, vector<8x64xf32>,
    return
  }
  func.func @transform_0(%arg0: i32) -> (i32, i32) {
    %c0_i32 = arith.constant 0 : i32
    %c0_i32_0 = arith.constant 0 : i32
    return %arg0, %c0_i32 : i32, i32
  }
  func.func @transform_1(%arg0: i32) -> (i32, i32) {
    %c0_i32 = arith.constant 0 : i32
    %c0_i32_0 = arith.constant 0 : i32
    %c0_i32_1 = arith.constant 0 : i32
    return %c0_i32, %c0_i32_0 : i32, i32
  }
  func.func @transform_2(%arg0: i32) -> (i32, i32) {
    %c0_i32 = arith.constant 0 : i32
    %c0_i32_0 = arith.constant 0 : i32
    %c0_i32_1 = arith.constant 0 : i32
    return %c0_i32, %c0_i32_0 : i32, i32
  }
  func.func @transform_3(%arg0: i32) -> (i32, i32) {
    %c0_i32 = arith.constant 0 : i32
    %c0_i32_0 = arith.constant 0 : i32
    %c0_i32_1 = arith.constant 0 : i32
    return %c0_i32, %c0_i32_0 : i32, i32
  }
  func.func @transform_4(%arg0: i32) -> (i32, i32) {
    %c0_i32 = arith.constant 0 : i32
    %c0_i32_0 = arith.constant 0 : i32
    %c0_i32_1 = arith.constant 0 : i32
    return %c0_i32, %c0_i32_0 : i32, i32
  }
  func.func @transform_5(%arg0: i32) -> (i32, i32) {
    %c0_i32 = arith.constant 0 : i32
    %c0_i32_0 = arith.constant 0 : i32
    %c0_i32_1 = arith.constant 0 : i32
    return %c0_i32, %c0_i32_0 : i32, i32
  }
  func.func @transform_6(%arg0: i32) -> (i32, i32) {
    %c0_i32 = arith.constant 0 : i32
    %c0_i32_0 = arith.constant 0 : i32
    %c0_i32_1 = arith.constant 0 : i32
    return %c0_i32, %c0_i32_0 : i32, i32
  }
  func.func @transform_7(%arg0: i32) -> (i32, i32) {
    %c0_i32 = arith.constant 0 : i32
    %c0_i32_0 = arith.constant 0 : i32
    return %arg0, %c0_i32 : i32, i32
  }
}

</mosaic_0001>

<bundles_post_ra>
// kernel: tpu_custom_call.1
= control target key start
LH: loop header
LB: loop body
LE: loop exit
PB: predicated region body
PF: predicated region fallthrough
CT: control target
= control target key end

     0   :  { %12 = vsyncpa [#allocation3], 0  ;;  %s583_s0 = inlined_call_operand.hbm [shape: f32[8,8], index: 0, kind: input, shape index: {}]   ;;  %s584_s1 = inlined_call_operand.hbm [shape: bf16[8,32], index: 1, kind: input, shape index: {}]   ;;  %s585_s2 = inlined_call_operand.vmem [shape: f32[1,32], index: 2, kind: input, shape index: {}]   ;;  %s586_s3 = inlined_call_operand.hbm [shape: bf16[32,32], index: 3, kind: input, shape index: {}]   ;;  %s587_s4 = inlined_call_operand.vmem [shape: f32[1,32], index: 4, kind: input, shape index: {}]   ;;  %s588_s5 = inlined_call_operand.vmem [shape: bf16[32,64], index: 5, kind: input, shape index: {}]   ;;  %s589_s6 = inlined_call_operand.vmem [shape: f32[1,64], index: 6, kind: input, shape index: {}]   ;;  %s590_s7 = inlined_call_operand.hbm [shape: f32[8,64], index: 7, kind: output, shape index: {}]  }
   0x1   :  { %13 = vsyncpa [#allocation6], 0 }
   0x2   :  { %14 = vsyncpa [#allocation4], 0  ;;  %s470_s24 = smov [#allocation5]   ;;  %s471_s26 = smov [#allocation2]  }
   0x3   :  { %s31_s25 = sshll.u32 %s470_s24, 4  ;;  %s21_s27 = sshll.u32 %s471_s26, 4  ;;  %s32_s25 = int_to_ptr.vmem [resolvable:$true] %s31_s25  ;;  %s22_s27 = int_to_ptr.vmem [resolvable:$true] %s21_s27 }
   0x4   :  { %s376_s30 = scalar_lea.hbm %s584_s1, 64 }
   0x5   :  { %p377_p0 = scmp.ne.s32.totalorder %s584_s1, %s376_s30  ;;  %p380_p1 = scmp.lt.u32.totalorder %s376_s30, %s584_s1 }
   0x7   :  { %p382_p2 = pnand %p380_p1, %p377_p0 }
   0x9   :  { %385 = shalt.err (!%p382_p2)
}
   0xa   :  { %s386_s12 = scalar_lea.vmem %s32_s25, 64  ;;  %p391_p4 = scmp.lt.s32.totalorder %s32_s25, %s32_s25 }
   0xb   :  { %p387_p3 = scmp.ne.s32.totalorder %s32_s25, %s386_s12  ;;  %p392_p5 = scmp.lt.s32.totalorder %s386_s12, %s386_s12 }
   0xd   :  { %p393_p6 = por %p392_p5, %p391_p4 }
   0xf   :  { %p394_p7 = pnand %p393_p6, %p387_p3 }
  0x11   :  { %397 = shalt.err (!%p394_p7)
}
  0x12   :  { %34 = dma.hbm_to_vmem [thread:$0]  %s584_s1, 64, %s32_s25, [#allocation6]  }
  0x13   :  { %s398_s17 = scalar_lea.hbm %s583_s0, 128 }
  0x14   :  { %p399_p8 = scmp.ne.s32.totalorder %s583_s0, %s398_s17  ;;  %p402_p9 = scmp.lt.u32.totalorder %s398_s17, %s583_s0 }
  0x16   :  { %p404_p10 = pnand %p402_p9, %p399_p8 }
  0x18   :  { %407 = shalt.err (!%p404_p10)
}
  0x19   :  { %s408_s22 = scalar_lea.vmem %s22_s27, 128  ;;  %p413_p12 = scmp.lt.s32.totalorder %s22_s27, %s22_s27 }
  0x1a   :  { %p409_p11 = scmp.ne.s32.totalorder %s22_s27, %s408_s22  ;;  %p414_p13 = scmp.lt.s32.totalorder %s408_s22, %s408_s22 }
  0x1c   :  { %p415_p0 = por %p414_p13, %p413_p12 }
  0x1e   :  { %p416_p1 = pnand %p415_p0, %p409_p11 }
  0x20   :  { %419 = shalt.err (!%p416_p1)
}
  0x21   :  { %24 = dma.hbm_to_vmem [thread:$0]  %s583_s0, 128, %s22_s27, [#allocation3]  }
  0x22   :  { %s472_s24 = smov [#allocation7]   ;;  %s420_s29 = scalar_lea.hbm %s586_s3, 256 }
  0x23   :  { %s42_s25 = sshll.u32 %s472_s24, 4  ;;  %p421_p2 = scmp.ne.s32.totalorder %s586_s3, %s420_s29  ;;  %s43_s25 = int_to_ptr.vmem [resolvable:$true] %s42_s25 }
  0x24   :  { %p424_p3 = scmp.lt.u32.totalorder %s420_s29, %s586_s3 }
  0x26   :  { %p426_p4 = pnand %p424_p3, %p421_p2 }
  0x28   :  { %429 = shalt.err (!%p426_p4)
}
  0x29   :  { %s430_s11 = scalar_lea.vmem %s43_s25, 256  ;;  %p435_p6 = scmp.lt.s32.totalorder %s43_s25, %s43_s25 }
  0x2a   :  { %p431_p5 = scmp.ne.s32.totalorder %s43_s25, %s430_s11  ;;  %p436_p7 = scmp.lt.s32.totalorder %s430_s11, %s430_s11 }
  0x2c   :  { %p437_p8 = por %p436_p7, %p435_p6 }
  0x2e   :  { %p438_p9 = pnand %p437_p8, %p431_p5 }
  0x30   :  { %441 = shalt.err (!%p438_p9)
}
  0x31   :  { %s473_s0 = smov 64   ;;  %s474_s27 = smov 4  }
  0x32   :  { %48 = dma.hbm_to_vmem [thread:$0]  %s586_s3, 256, %s43_s25, [#allocation6], %s473_s0, %s473_s0, %s474_s27  }
  0x33   :  { %464 = dma.done.wait [#allocation3], 128  }
  0x34   :  { %465 = vsyncadd [#allocation3], 4294967168 }
  0x35   :  { %466 = dma.done.wait [#allocation6], 320  }
  0x36   :  { %467 = vsyncadd [#allocation6], 4294966976  ;;  %v475_v0 = vmov 0.0   ;;  %vm476_vm0 = vmmov 0   ;;  %vm79_vm1 = vcmask 1043456   ;;  %v65_v2 = vld [vmem:[#allocation2] sm:$0xff] }
  0x37   :  { %330 = vmatprep.subr.bf16.mxu0 %v475_v0  ;;  %332 = vmatprep.mubr.msk.bf16.mxu0 %vm476_vm0, %v475_v0  ;;  %v67_v1 = vld [vmem:[#allocation5] sm:$0xf]  ;;  %v66_v4 = vpack.c.bf16 %v65_v2, %v65_v2  ;;  %vm75_vm2 = vcmask 64512   ;;  %v360_v5 = vld [vmem:[#allocation7] sm:$0xff]   ;;  %v361_v6 = vld [vmem:[#allocation7 + $0x8] sm:$0xff]   ;;  %vm161_vm5 = vcmask 261120  }
  0x38   :  { %336 = vmatprep.subr.bf16.mxu1 %v475_v0  ;;  %340 = vmatprep.mubr.msk.bf16.mxu1 %vm476_vm0, %v475_v0  ;;  %v81_v3 = vsel %vm79_vm1, %v67_v1, 0  ;;  %v312_v7 = vld [vmem:[%s585_s2] ss:$0 sm:$0xff]  ;;  %v363_v27 = vld [vmem:[%s588_s5 + $0x8] sm:$0xff]   ;;  %s477_s20 = smov [#allocation8]   ;;  %vm294_vm8 = vcmask 523264  }
  0x39   :  { %331 = vmatpush3.bf16.msra.mxu0 %v81_v3  ;;  %337 = vmatpush3.bf16.msra.mxu1 %v360_v5  ;;  %v362_v26 = vld [vmem:[%s588_s5] sm:$0xff]   ;;  %s302_s21 = sshll.u32 %s477_s20, 4  ;;  %s303_s21 = int_to_ptr.vmem [resolvable:$true] %s302_s21 }
  0x3a   :  { %344 = vmatprep.subr.bf16.mxu0 %v475_v0  ;;  %338 = vmatprep.subr.bf16.mxu1 %v475_v0  ;;  %v314_v28 = vld [vmem:[%s587_s4] ss:$0 sm:$0xff]  ;;  %p447_p11 = scmp.lt.s32.totalorder %s303_s21, %s303_s21 }
  0x3b   :  { %v318_v47 = vld [vmem:[%s589_s6] ss:$0 sm:$0xff]  ;;  %s442_s6 = scalar_lea.vmem %s303_s21, 128 }
  0x3c   :  { %333 = vmatmul.mubr.msk.bf16.vlgmr.msra.gmra.mrb[0].mxu0 %vm75_vm2, %v66_v4  ;;  %p443_p10 = scmp.ne.s32.totalorder %s303_s21, %s442_s6  ;;  %p448_p12 = scmp.lt.s32.totalorder %s442_s6, %s442_s6 }
  0x3d   :  { %348 = vmatprep.mubr.msk.bf16.mxu0 %vm476_vm0, %v475_v0  ;;  %339 = vmatpush3.bf16.msra.mxu1 %v361_v6 }
  0x3e   :  { %345 = vmatpush3.bf16.msra.mxu0 %v362_v26  ;;  %p449_p13 = por %p448_p12, %p447_p11 }
  0x3f   :  { %346 = vmatprep.subr.bf16.mxu0 %v475_v0 }
  0x40   :  { %p450_p0 = pnand %p449_p13, %p443_p10 }
  0x42   :  { %347 = vmatpush3.bf16.msra.mxu0 %v363_v27 }
 0x10f   :  { %v117_v8 = vpop.f32.mrb[0].mxu0 }
 0x110   :  { %v118_v9 = vadd.f32 %v312_v7, %v117_v8  ;;  %v334_v10 = vpop.f32.mrb[1].mxu0 }
 0x111   :  { %v120_v11 = vpop.f32.mrb[2].mxu0 }
 0x112   :  { %v124_v12 = vmin.f32 %v118_v9, 20.0  ;;  %v335_v13 = vpop.f32.mrb[3].mxu0  ;;  %vm123_vm4 = vcmp.gt.f32.partialorder %v118_v9, 20.0 }
 0x114   :  { %v125_v14 = vmul.f32 1.442695, %v124_v12 }
 0x116   :  { %364 = vpow2.f32 %v125_v14 }
 0x120   :  { %v365_v15 = vpop.eup %364 }
 0x121   :  { %v127_v16 = vadd.f32 1.0, %v365_v15  ;;  %v130_v17 = vmul.f32 -0.5, %v365_v15  ;;  %v133_v19 = vand.u32 2147483647, %v365_v15 }
 0x123   :  { %366 = vlog2.f32 %v127_v16  ;;  %v131_v18 = vadd.f32 1.0, %v130_v17  ;;  %vm134_vm3 = vcmp.lt.f32.partialorder %v133_v19, 0.0004427343 }
 0x125   :  { %v132_v22 = vmul.f32 %v365_v15, %v131_v18 }
 0x12d   :  { %v367_v20 = vpop.eup %366 }
 0x12e   :  { %v129_v21 = vmul.f32 0.6931472, %v367_v20 }
 0x130   :  { %v135_v23 = vsel %vm134_vm3, %v132_v22, %v129_v21 }
 0x131   :  { %v136_v24 = vsel %vm123_vm4, %v118_v9, %v135_v23 }
 0x132   :  { %v137_v25 = vpack.c.bf16 %v136_v24, %v136_v24 }
 0x134   :  { %341 = vmatmul.mubr.msk.bf16.vlgmr.msra.gmra.mrb[0].mxu1 %vm161_vm5, %v137_v25 }
 0x207   :  { %v199_v29 = vpop.f32.mrb[0].mxu1 }
 0x208   :  { %v200_v30 = vadd.f32 %v314_v28, %v199_v29  ;;  %v342_v31 = vpop.f32.mrb[1].mxu1 }
 0x209   :  { %v202_v32 = vpop.f32.mrb[2].mxu1 }
 0x20a   :  { %v206_v33 = vmin.f32 %v200_v30, 20.0  ;;  %v343_v34 = vpop.f32.mrb[3].mxu1  ;;  %vm205_vm7 = vcmp.gt.f32.partialorder %v200_v30, 20.0 }
 0x20c   :  { %v207_v35 = vmul.f32 1.442695, %v206_v33 }
 0x20e   :  { %368 = vpow2.f32 %v207_v35 }
 0x218   :  { %v369_v36 = vpop.eup %368 }
 0x219   :  { %v209_v37 = vadd.f32 1.0, %v369_v36  ;;  %v212_v38 = vmul.f32 -0.5, %v369_v36  ;;  %v215_v40 = vand.u32 2147483647, %v369_v36 }
 0x21b   :  { %370 = vlog2.f32 %v209_v37  ;;  %v213_v39 = vadd.f32 1.0, %v212_v38  ;;  %vm216_vm6 = vcmp.lt.f32.partialorder %v215_v40, 0.0004427343 }
 0x21d   :  { %v214_v43 = vmul.f32 %v369_v36, %v213_v39 }
 0x225   :  { %v371_v41 = vpop.eup %370 }
 0x226   :  { %v211_v42 = vmul.f32 0.6931472, %v371_v41 }
 0x228   :  { %v217_v44 = vsel %vm216_vm6, %v214_v43, %v211_v42 }
 0x229   :  { %v218_v45 = vsel %vm205_vm7, %v200_v30, %v217_v44 }
 0x22a   :  { %v219_v46 = vpack.c.bf16 %v218_v45, %v218_v45 }
 0x22c   :  { %349 = vmatmul.mubr.msk.bf16.vlgmr.msra.gmra.mrb[4].mxu0 %vm161_vm5, %v219_v46 }
 0x2ff   :  { %v280_v48 = vpop.f32.mrb[4].mxu0 }
 0x300   :  { %v281_v49 = vadd.f32 %v318_v47, %v280_v48  ;;  %v350_v50 = vpop.f32.mrb[5].mxu0 }
 0x301   :  { %v283_v51 = vpop.f32.mrb[6].mxu0 }
 0x302   :  { %v286_v52 = vsub.f32 0.0, %v281_v49  ;;  %v351_v53 = vpop.f32.mrb[7].mxu0 }
 0x304   :  { %v287_v54 = vmul.f32 1.442695, %v286_v52 }
 0x306   :  { %372 = vpow2.f32 %v287_v54 }
 0x310   :  { %v373_v55 = vpop.eup %372 }
 0x311   :  { %v289_v56 = vadd.f32 1.0, %v373_v55 }
 0x313   :  { %374 = vrcp.f32 %v289_v56 }
 0x31d   :  { %v375_v57 = vpop.eup %374 }
 0x31e   :  { %v291_v58 = vmul.f32 %v375_v57, %v289_v56 }
 0x320   :  { %v292_v59 = vsub.f32 2.0, %v291_v58 }
 0x322   :  { %v293_v60 = vmul.f32 %v375_v57, %v292_v59 }
 0x324   :  { %295 = vst.msk [vmem:[#allocation8] sm:$0xff] %vm294_vm8, %v293_v60 }
 0x325   :  { %453 = shalt.err (!%p450_p0)
}
 0x326   :  { %s454_s23 = scalar_lea.hbm %s590_s7, 128 }
 0x327   :  { %p455_p1 = scmp.ne.s32.totalorder %s590_s7, %s454_s23  ;;  %p458_p2 = scmp.lt.u32.totalorder %s454_s23, %s590_s7 }
 0x329   :  { %p460_p3 = pnand %p458_p2, %p455_p1 }
 0x32b   :  { %463 = shalt.err (!%p460_p3)
}
 0x32c   :  { %305 = dma.vmem_to_hbm [thread:$0]  %s303_s21, 128, %s590_s7, [#allocation4]  }
 0x32d   :  { %468 = dma.done.wait [#allocation4], 128  }
 0x32e   :  { %469 = vsyncadd [#allocation4], 4294967168 }
 0x32f   :  { %309 = vsyncpa [#allocation3], 1 }
 0x330   :  { %310 = vsyncpa [#allocation6], 1 }
 0x331   :  { %311 = vsyncpa [#allocation4], 1 }

</bundles_post_ra>
